<compile_context>
chip_gen: v7x
topology: tpu7x:2x2x1
jax: 0.10.0
libtpu: 0.0.40
codegen_flags: <defaults>
</compile_context>

<pallas_src>
import math
from functools import partial

import jax
import jax.numpy as jnp
from jax.experimental import pallas as pl
from jax.experimental.pallas import tpu as pltpu


def make_positional_encoding(max_len: int, d_model: int, dtype=jnp.float32):
    """Deterministic buffer init, mirrors PositionalEncoding.__init__ (d_model even)."""
    position = jnp.arange(max_len, dtype=jnp.float32)[:, None]              # [max_len, 1]
    div_term = jnp.exp(
        jnp.arange(0, d_model, 2, dtype=jnp.float32) * (-math.log(10000.0) / d_model)
    )                                                                        # [d_model/2]
    pe = jnp.zeros((max_len, d_model), dtype=jnp.float32)
    pe = pe.at[:, 0::2].set(jnp.sin(position * div_term))
    pe = pe.at[:, 1::2].set(jnp.cos(position * div_term))
    return pe.astype(dtype)                                                  # [max_len, d_model]


def _pe_add_kernel(x_ref, pe_ref, o_ref, *, batch: int):
    # x_ref/o_ref: (TS, B*D) lane-dense slab; pe_ref: (TS, D) matching PE tile.
    pe = pe_ref[...]
    if batch > 1:
        # Broadcast over the batch axis in-VMEM (lane tiling). This keeps PE
        # HBM traffic at S*D; it is VPU/XLU filler hidden under the DMAs.
        pe = jnp.tile(pe, (1, batch))                                        # (TS, B*D)
    o_ref[...] = x_ref[...] + pe


def _round_up(v: int, m: int) -> int:
    return ((v + m - 1) // m) * m


def positional_encoding_forward(x: jax.Array, pe: jax.Array,
                                *, target_block_bytes: int = 4 << 20) -> jax.Array:
    """x: [seq_len, batch, d_model]; pe: [max_len, d_model] with max_len >= seq_len."""
    S, B, D = x.shape
    max_len, d_model = pe.shape
    if d_model != D:
        raise ValueError(f"d_model mismatch: x has {D}, pe has {d_model}")
    if S > max_len:
        raise ValueError(f"seq_len {S} exceeds positional-encoding max_len {max_len}")

    pe_slice = pe[:S].astype(x.dtype)                                        # [S, D]
    itemsize = jnp.dtype(x.dtype).itemsize
    row_bytes = B * D * itemsize

    # Sequence-tile sizing (multiples of 8 sublane rows):
    #   * target ~4 MiB per x/out block (bandwidth-bound sweet spot),
    #   * prefer >= ~8 grid steps (pipelining + v7x megacore sharding) as long
    #     as blocks stay >= ~1 MiB,
    #   * never exceed the (8-padded) sequence length; last block may be partial.
    steps_target = 8
    ts_bytes = max(8, (target_block_bytes // row_bytes) // 8 * 8)
    ts_steps = _round_up(max(1, pl.cdiv(S, steps_target)), 8)
    ts_floor = max(8, ((1 << 20) // row_bytes) // 8 * 8)
    ts = max(min(ts_bytes, ts_steps), min(ts_floor, ts_bytes))
    ts = min(ts, _round_up(S, 8))
    grid = (pl.cdiv(S, ts),)

    # Double-buffered VMEM footprint: 2x (x block + out block) + 2x pe block
    # + headroom.  With the 4 MiB target this is ~20-25 MiB: under the default
    # scoped limits on v6e/v7x and explicitly raised past v5e's 16 MiB default.
    x_block_bytes = ts * B * D * itemsize
    pe_block_bytes = ts * D * itemsize
    vmem_limit = int(2 * (2 * x_block_bytes + pe_block_bytes) + (2 << 20))

    cost = pl.CostEstimate(
        flops=S * B * D,
        transcendentals=0,
        bytes_accessed=2 * S * B * D * itemsize + S * D * itemsize,
    )

    out2 = pl.pallas_call(
        partial(_pe_add_kernel, batch=B),
        out_shape=jax.ShapeDtypeStruct((S, B * D), x.dtype),
        grid_spec=pltpu.PrefetchScalarGridSpec(
            num_scalar_prefetch=0,
            grid=grid,
            in_specs=[
                pl.BlockSpec((ts, B * D), lambda i: (i, 0)),   # x, lane-dense
                pl.BlockSpec((ts, D), lambda i: (i, 0)),       # PE tile
            ],
            out_specs=pl.BlockSpec((ts, B * D), lambda i: (i, 0)),
        ),
        compiler_params=pltpu.CompilerParams(
            dimension_semantics=("parallel",),
            vmem_limit_bytes=vmem_limit,
        ),
        cost_estimate=cost,
    )(x.reshape(S, B * D), pe_slice)

    return out2.reshape(S, B, D)


if __name__ == "__main__":
    def reference(x, pe):
        # Pure-JAX reference of the PyTorch forward: x + pe[:seq_len] broadcast over batch.
        return x + pe[: x.shape[0]].astype(x.dtype)[:, None, :]

    key = jax.random.PRNGKey(0)
    # (seq_len, batch, d_model, max_len):
    #   * tiny case matching the module's small-shape demo (B*D=64, lane-padded path)
    #   * lane-dense case (B*D=256) with a non-multiple-of-8 sequence length
    #   * PyTorch-default max_len case that exercises a multi-step grid + partial tail
    cases = [
        (16, 2, 32, 64),
        (100, 4, 64, 128),
        (5000, 2, 32, 5000),
    ]
    for idx, (S, B, D, max_len) in enumerate(cases):
        key, sub = jax.random.split(key)
        x = jax.random.normal(sub, (S, B, D), dtype=jnp.float32)
        pe = make_positional_encoding(max_len, D)

        out = jax.block_until_ready(positional_encoding_forward(x, pe))
        ref = reference(x, pe)

        assert out.shape == x.shape and out.dtype == x.dtype, f"case {idx}: shape/dtype mismatch"
        assert jnp.allclose(out, ref, atol=1e-6, rtol=1e-6), f"case {idx}: value mismatch"

    print("KERNEL_OK")
</pallas_src>

<mosaic_0001>
module attributes {stable_mosaic.version = 11 : i64} {
  func.func @_pe_add_kernel(%arg0: i32, %arg1: memref<16x64xf32, #tpu.memory_space<vmem>>, %arg2: memref<16x32xf32, #tpu.memory_space<vmem>>, %arg3: memref<16x64xf32, #tpu.memory_space<vmem>>) attributes {dimension_semantics = [#tpu.dimension_semantics<parallel>], iteration_bounds = array<i64: 1>, scalar_prefetch = 0 : i64, scratch_operands = 0 : i64, tpu.core_type = #tpu.core_type<tc>, window_params = [{transform_indices = @transform_0, window_bounds = array<i64: 16, 64>}, {transform_indices = @transform_1, window_bounds = array<i64: 16, 32>}, {transform_indices = @transform_2, window_bounds = array<i64: 16, 64>}]} {
    %c0 = arith.constant 0 : index
    %c0_0 = arith.constant 0 : index
    %0 = vector.load %arg2[%c0, %c0_0] : memref<16x32xf32, #tpu.memory_space<vmem>>, vector<16x32xf32>
    %1 = tpu.concatenate %0, %0 in 1 : vector<16x32xf32>, vector<16x32xf32> -> vector<16x64xf32>
    %c0_1 = arith.constant 0 : index
    %c0_2 = arith.constant 0 : index
    %2 = vector.load %arg1[%c0_1, %c0_2] : memref<16x64xf32, #tpu.memory_space<vmem>>, vector<16x64xf32>
    %3 = arith.addf %2, %1 : vector<16x64xf32>
    %c0_3 = arith.constant 0 : index
    %c0_4 = arith.constant 0 : index
    %4 = vector.load %arg3[%c0_3, %c0_4] : memref<16x64xf32, #tpu.memory_space<vmem>>, vector<16x64xf32>
    tpu.vector_store %arg3[%c0_3, %c0_4], %3 {strides = array<i32>} : memref<16x64xf32, #tpu.memory_space<vmem>>, vector<16x64xf32>,
    return
  }
  func.func @transform_0(%arg0: i32) -> (i32, i32) {
    %c0_i32 = arith.constant 0 : i32
    %c0_i32_0 = arith.constant 0 : i32
    return %arg0, %c0_i32 : i32, i32
  }
  func.func @transform_1(%arg0: i32) -> (i32, i32) {
    %c0_i32 = arith.constant 0 : i32
    %c0_i32_0 = arith.constant 0 : i32
    return %arg0, %c0_i32 : i32, i32
  }
  func.func @transform_2(%arg0: i32) -> (i32, i32) {
    %c0_i32 = arith.constant 0 : i32
    %c0_i32_0 = arith.constant 0 : i32
    return %arg0, %c0_i32 : i32, i32
  }
}

</mosaic_0001>

<bundles_post_ra>
// kernel: tpu_custom_call.1
= control target key start
LH: loop header
LB: loop body
LE: loop exit
PB: predicated region body
PF: predicated region fallthrough
CT: control target
= control target key end

     0   :  { %7 = vsyncpa [#allocation3], 0  ;;  %s222_s0 = inlined_call_operand.hbm [shape: f32[16,64], index: 0, kind: input, shape index: {}]   ;;  %s223_s1 = inlined_call_operand.hbm [shape: f32[16,32], index: 1, kind: input, shape index: {}]   ;;  %s224_s2 = inlined_call_operand.hbm [shape: f32[16,64], index: 2, kind: output, shape index: {}]  }
   0x1   :  { %8 = vsyncpa [#allocation6], 0 }
   0x2   :  { %9 = vsyncpa [#allocation4], 0  ;;  %s156_s9 = smov [#allocation2]   ;;  %s84_s13 = scalar_lea.hbm %s222_s0, 256 }
   0x3   :  { %s15_s10 = sshll.u32 %s156_s9, 4  ;;  %p85_p0 = scmp.ne.s32.totalorder %s222_s0, %s84_s13  ;;  %s16_s10 = int_to_ptr.vmem [resolvable:$true] %s15_s10 }
   0x4   :  { %p88_p1 = scmp.lt.u32.totalorder %s84_s13, %s222_s0 }
   0x6   :  { %p90_p2 = pnand %p88_p1, %p85_p0 }
   0x8   :  { %93 = shalt.err (!%p90_p2)
}
   0x9   :  { %s94_s18 = scalar_lea.vmem %s16_s10, 256  ;;  %p99_p4 = scmp.lt.s32.totalorder %s16_s10, %s16_s10 }
   0xa   :  { %p95_p3 = scmp.ne.s32.totalorder %s16_s10, %s94_s18  ;;  %p100_p5 = scmp.lt.s32.totalorder %s94_s18, %s94_s18 }
   0xc   :  { %p101_p6 = por %p100_p5, %p99_p4 }
   0xe   :  { %p102_p7 = pnand %p101_p6, %p95_p3 }
  0x10   :  { %105 = shalt.err (!%p102_p7)
}
  0x11   :  { %s157_s19 = smov 128   ;;  %s158_s20 = smov 8  }
  0x12   :  { %21 = dma.hbm_to_vmem [thread:$0]  %s222_s0, 256, %s16_s10, [#allocation3], %s157_s19, %s157_s19, %s158_s20  }
  0x13   :  { %s159_s23 = smov [#allocation5]   ;;  %s106_s27 = scalar_lea.hbm %s223_s1, 256 }
  0x14   :  { %s27_s24 = sshll.u32 %s159_s23, 4  ;;  %p107_p8 = scmp.ne.s32.totalorder %s223_s1, %s106_s27  ;;  %s28_s24 = int_to_ptr.vmem [resolvable:$true] %s27_s24 }
  0x15   :  { %p110_p9 = scmp.lt.u32.totalorder %s106_s27, %s223_s1 }
  0x17   :  { %p112_p10 = pnand %p110_p9, %p107_p8 }
  0x19   :  { %115 = shalt.err (!%p112_p10)
}
  0x1a   :  { %s116_s4 = scalar_lea.vmem %s28_s24, 256  ;;  %p121_p12 = scmp.lt.s32.totalorder %s28_s24, %s28_s24 }
  0x1b   :  { %p117_p11 = scmp.ne.s32.totalorder %s28_s24, %s116_s4  ;;  %p122_p13 = scmp.lt.s32.totalorder %s116_s4, %s116_s4 }
  0x1d   :  { %p123_p0 = por %p122_p13, %p121_p12 }
  0x1f   :  { %p124_p1 = pnand %p123_p0, %p117_p11 }
  0x21   :  { %127 = shalt.err (!%p124_p1)
}
  0x22   :  { %33 = dma.hbm_to_vmem [thread:$0]  %s223_s1, 256, %s28_s24, [#allocation6], %s157_s19, %s157_s19, %s158_s20  }
  0x23   :  { %150 = dma.done.wait [#allocation3], 256  }
  0x24   :  { %151 = vsyncadd [#allocation3], 4294967040 }
  0x25   :  { %152 = dma.done.wait [#allocation6], 256  }
  0x26   :  { %153 = vsyncadd [#allocation6], 4294967040  ;;  %v40_v0 = vld [vmem:[#allocation5] sm:$0xff]  ;;  %s160_s6 = smov 32   ;;  %v41_v1 = vld [vmem:[#allocation5 + $0x8] sm:$0xff]  ;;  %vm50_vm0 = vcmask 261120  }
  0x27   :  { %44 = vrot.lane.b32.xlu0 %v40_v0, %s160_s6  ;;  %v53_v2 = vld [vmem:[#allocation2] sm:$0xff]  ;;  %vm57_vm1 = vcmask 523264   ;;  %v54_v6 = vld [vmem:[#allocation2 + $0x8] sm:$0xff]  ;;  %s161_s7 = smov [#allocation7]  }
  0x28   :  { %s65_s8 = sshll.u32 %s161_s7, 4  ;;  %s66_s8 = int_to_ptr.vmem [resolvable:$true] %s65_s8 }
  0x29   :  { %s128_s1 = scalar_lea.vmem %s66_s8, 256  ;;  %p133_p3 = scmp.lt.s32.totalorder %s66_s8, %s66_s8 }
  0x2a   :  { %p129_p2 = scmp.ne.s32.totalorder %s66_s8, %s128_s1  ;;  %p134_p4 = scmp.lt.s32.totalorder %s128_s1, %s128_s1 }
  0x2b   :  { %46 = vrot.lane.b32.xlu0 %v41_v1, %s160_s6 }
  0x2c   :  { %p135_p5 = por %p134_p4, %p133_p3 }
  0x2e   :  { %p136_p6 = pnand %p135_p5, %p129_p2 }
  0x99   :  { %v45_v3 = vpop.permute.xlu0 %44 }
  0x9a   :  { %v51_v4 = vsel %vm50_vm0, %v40_v0, %v45_v3 }
  0x9b   :  { %v55_v5 = vadd.f32 %v53_v2, %v51_v4 }
  0x9d   :  { %v47_v7 = vpop.permute.xlu0 %46  ;;  %58 = vst.msk [vmem:[#allocation7] sm:$0xff] %vm57_vm1, %v55_v5 }
  0x9e   :  { %v52_v8 = vsel %vm50_vm0, %v41_v1, %v47_v7 }
  0x9f   :  { %v56_v9 = vadd.f32 %v54_v6, %v52_v8 }
  0xa1   :  { %59 = vst.msk [vmem:[#allocation7 + $0x8] sm:$0xff] %vm57_vm1, %v56_v9 }
  0xa2   :  { %139 = shalt.err (!%p136_p6)
}
  0xa3   :  { %s140_s11 = scalar_lea.hbm %s224_s2, 256 }
  0xa4   :  { %p141_p7 = scmp.ne.s32.totalorder %s224_s2, %s140_s11  ;;  %p144_p8 = scmp.lt.u32.totalorder %s140_s11, %s224_s2 }
  0xa6   :  { %p146_p9 = pnand %p144_p8, %p141_p7 }
  0xa8   :  { %149 = shalt.err (!%p146_p9)
}
  0xa9   :  { %71 = dma.vmem_to_hbm [thread:$0]  %s66_s8, 256, %s224_s2, [#allocation4], %s157_s19, %s157_s19, %s158_s20  }
  0xaa   :  { %154 = dma.done.wait [#allocation4], 256  }
  0xab   :  { %155 = vsyncadd [#allocation4], 4294967040 }
  0xac   :  { %75 = vsyncpa [#allocation3], 1 }
  0xad   :  { %76 = vsyncpa [#allocation6], 1 }
  0xae   :  { %77 = vsyncpa [#allocation4], 1 }

</bundles_post_ra>
